<compile_context>
chip_gen: v6e
topology: v6e:2x2x1
jax: 0.10.0
libtpu: 0.0.40
codegen_flags: <defaults>
</compile_context>

<pallas_src>
import functools

import jax
import jax.numpy as jnp
import numpy as np
from jax.experimental import pallas as pl
from jax.experimental.pallas import tpu as pltpu


def _pool_expand_kernel(x_ref, p_ref, o_ref, *, c_in: int, c_out: int, b_tile: int):
    """x_ref: (b_tile*c_in, S_in); p_ref: (S_in, S_out) f32; o_ref: (b_tile*c_out, S_out)."""
    x = x_ref[...]
    if x.dtype != jnp.float32:
        x = x.astype(jnp.float32)
    # Entire s*s average pool as a single MXU matmul (1/s^2 folded into p_ref).
    y = jnp.dot(x, p_ref[...], preferred_element_type=jnp.float32)
    y = y.astype(o_ref.dtype)

    s_out = o_ref.shape[-1]
    n_zero = c_out - c_in
    if n_zero > 0:
        zero_rows = jnp.zeros((n_zero, s_out), o_ref.dtype)   # hoisted out of the loop

    for j in range(b_tile):                                   # static unroll (b_tile small)
        o_ref[j * c_out:j * c_out + c_in, :] = y[j * c_in:(j + 1) * c_in, :]
        if n_zero > 0:
            o_ref[j * c_out + c_in:(j + 1) * c_out, :] = zero_rows


def _vmem_capacity_bytes() -> int:
    try:
        return int(pltpu.get_tpu_info().vmem_capacity_bytes)
    except Exception:
        return 64 * 1024 * 1024        # conservative: v7x per-TensorCore VMEM


def _pool_matrix(hc: int, wc: int, ho: int, wo: int, stride: int):
    """(Hc*Wc, Ho*Wo) matrix P with P[h*Wc+w, (h//s)*Wo + w//s] = 1/s^2."""
    cols = (np.arange(hc)[:, None] // stride) * wo + (np.arange(wc)[None, :] // stride)
    p = np.zeros((hc * wc, ho * wo), np.float32)
    p[np.arange(hc * wc), cols.reshape(-1)] = 1.0 / float(stride * stride)
    return jnp.asarray(p)


def _choose_batch_tile(n, c_in, c_out, s_in, s_out, itemsize, budget_bytes, max_unroll=32):
    """Largest divisor of n that keeps sublane alignment, fits the VMEM budget
    (double-buffered in/out blocks + in-kernel f32 temporaries), bounded unroll,
    preferring >= 2 grid steps (v7x dual TensorCore) when possible."""
    def aligned(t):
        return t == n or ((t * c_in) % 8 == 0 and (t * c_out) % 8 == 0)

    def need(t):
        return (2 * t * (c_in * s_in + c_out * s_out) * itemsize   # double-buffered blocks
                + t * c_in * (s_in + s_out) * 4)                   # f32 cast + f32 matmul out

    divs = [t for t in range(1, n + 1) if n % t == 0 and aligned(t)]
    fitting = [t for t in divs if t <= max_unroll and need(t) <= budget_bytes]
    if fitting:
        t = max(fitting)
        if n // t < 2:
            smaller = [u for u in fitting if n // u >= 2]
            if smaller:
                t = max(smaller)
        return t
    return min(divs)


@functools.partial(jax.jit, static_argnames=("n_out", "stride"))
def downsample_b(x, *, n_out: int, stride: int):
    """Pallas TPU implementation of DownsampleB.forward.  x: (N, nIn, H, W) NCHW."""
    n, c_in, h, w = x.shape
    expand_ratio = max(n_out // c_in, 1)        # PyTorch integer division semantics
    c_out = c_in * expand_ratio
    dtype = x.dtype
    itemsize = dtype.itemsize

    if stride == 1:
        # AvgPool2d(1) is identity: only the zero channel expansion remains.
        if expand_ratio == 1:
            return x
        zeros = jnp.zeros((n, c_out - c_in, h, w), dtype)
        return jnp.concatenate([x, zeros], axis=1)

    ho, wo = h // stride, w // stride
    hc, wc = ho * stride, wo * stride
    s_in, s_out = hc * wc, ho * wo

    # Floor-crop (no-op when H, W divide the stride), then free row-major flatten.
    xc = x if (hc == h and wc == w) else x[:, :, :hc, :wc]
    x2 = xc.reshape(n * c_in, s_in)

    pool_mat = _pool_matrix(hc, wc, ho, wo, stride)
    p_bytes = s_in * s_out * 4

    cap = _vmem_capacity_bytes()
    b_tile = _choose_batch_tile(n, c_in, c_out, s_in, s_out, itemsize,
                                budget_bytes=cap // 6)
    grid = (n // b_tile,)

    in_blk = b_tile * c_in * s_in * itemsize
    out_blk = b_tile * c_out * s_out * itemsize
    tmp_f32 = b_tile * c_in * (s_in + s_out) * 4
    vmem_need = 2 * (in_blk + out_blk) + 2 * p_bytes + tmp_f32
    vmem_limit = int(min(max(2 * vmem_need, 32 * 1024 * 1024), (cap * 3) // 4))

    out2 = pl.pallas_call(
        functools.partial(_pool_expand_kernel, c_in=c_in, c_out=c_out, b_tile=b_tile),
        out_shape=jax.ShapeDtypeStruct((n * c_out, s_out), dtype),
        grid=grid,
        in_specs=[
            pl.BlockSpec((b_tile * c_in, s_in), lambda b: (b, 0)),
            pl.BlockSpec((s_in, s_out), lambda b: (0, 0)),   # pooling matrix: VMEM-resident
        ],
        out_specs=pl.BlockSpec((b_tile * c_out, s_out), lambda b: (b, 0)),
        compiler_params=pltpu.CompilerParams(
            dimension_semantics=("parallel",),
            vmem_limit_bytes=vmem_limit),
        cost_estimate=pl.CostEstimate(
            flops=int(2 * n * c_in * s_in * s_out),
            transcendentals=0,
            bytes_accessed=int(n * c_in * s_in * itemsize
                               + n * c_out * s_out * itemsize + p_bytes)),
    )(x2, pool_mat)

    # Free row-major reshape back to NCHW.
    return out2.reshape(n, c_out, ho, wo)


if __name__ == "__main__":
    key = jax.random.PRNGKey(0)
    N, nIn, H, W = 2, 4, 16, 16
    stride = 2
    nOut = 8  # expand_ratio = 2

    x = jax.random.normal(key, (N, nIn, H, W), dtype=jnp.float32)

    y = jax.block_until_ready(downsample_b(x, n_out=nOut, stride=stride))

    # Pure-JAX reference (matches PyTorch AvgPool2d(stride) + zero-channel concat).
    ho, wo = H // stride, W // stride
    ref_pool = x[:, :, :ho * stride, :wo * stride].reshape(
        N, nIn, ho, stride, wo, stride).mean(axis=(3, 5))
    ref = jnp.concatenate(
        [ref_pool, jnp.zeros((N, nOut - nIn, ho, wo), x.dtype)], axis=1)

    assert y.shape == (N, nOut, ho, wo), y.shape
    np.testing.assert_allclose(np.asarray(y), np.asarray(ref), rtol=1e-5, atol=1e-5)

    print("KERNEL_OK")
</pallas_src>

<mosaic_0001>
module attributes {stable_mosaic.version = 11 : i64} {
  func.func @_pool_expand_kernel(%arg0: i32, %arg1: memref<8x256xf32, #tpu.memory_space<vmem>>, %arg2: memref<256x64xf32, #tpu.memory_space<vmem>>, %arg3: memref<16x64xf32, #tpu.memory_space<vmem>>) attributes {dimension_semantics = [#tpu.dimension_semantics<parallel>], iteration_bounds = array<i64: 1>, scalar_prefetch = 0 : i64, scratch_operands = 0 : i64, tpu.core_type = #tpu.core_type<tc>, window_params = [{transform_indices = @transform_0, window_bounds = array<i64: 8, 256>}, {pipeline_mode = #tpu.pipeline_mode<synchronous>, transform_indices = @transform_1, window_bounds = array<i64: 256, 64>}, {transform_indices = @transform_2, window_bounds = array<i64: 16, 64>}]} {
    %c0 = arith.constant 0 : index
    %c0_0 = arith.constant 0 : index
    %0 = vector.load %arg1[%c0, %c0_0] : memref<8x256xf32, #tpu.memory_space<vmem>>, vector<8x256xf32>
    %c0_1 = arith.constant 0 : index
    %c0_2 = arith.constant 0 : index
    %1 = vector.load %arg2[%c0_1, %c0_2] : memref<256x64xf32, #tpu.memory_space<vmem>>, vector<256x64xf32>
    %cst = arith.constant dense<0.000000e+00> : vector<8x64xf32>
    %2 = tpu.matmul %0, %1, %cst {dimension_numbers = #tpu.dot_dimension_numbers<[1], [0], [0], [1], [0, 0, 1, 1], [], []>} : vector<8x256xf32>, vector<256x64xf32>, vector<8x64xf32> -> vector<8x64xf32>
    %cst_3 = arith.constant 0.000000e+00 : f32
    %3 = vector.broadcast %cst_3 : f32 to vector<4x64xf32>
    %4 = vector.extract_strided_slice %2 {offsets = [0, 0], sizes = [4, 64], strides = [1, 1]} : vector<8x64xf32> to vector<4x64xf32>
    %c0_4 = arith.constant 0 : index
    %c0_5 = arith.constant 0 : index
    %5 = vector.load %arg3[%c0_4, %c0_5] : memref<16x64xf32, #tpu.memory_space<vmem>>, vector<4x64xf32>
    tpu.vector_store %arg3[%c0_4, %c0_5], %4 {strides = array<i32>} : memref<16x64xf32, #tpu.memory_space<vmem>>, vector<4x64xf32>,
    %c4 = arith.constant 4 : index
    %c0_6 = arith.constant 0 : index
    %6 = vector.load %arg3[%c4, %c0_6] : memref<16x64xf32, #tpu.memory_space<vmem>>, vector<4x64xf32>
    tpu.vector_store %arg3[%c4, %c0_6], %3 {strides = array<i32>} : memref<16x64xf32, #tpu.memory_space<vmem>>, vector<4x64xf32>,
    %7 = vector.extract_strided_slice %2 {offsets = [4, 0], sizes = [4, 64], strides = [1, 1]} : vector<8x64xf32> to vector<4x64xf32>
    %c8 = arith.constant 8 : index
    %c0_7 = arith.constant 0 : index
    %8 = vector.load %arg3[%c8, %c0_7] : memref<16x64xf32, #tpu.memory_space<vmem>>, vector<4x64xf32>
    tpu.vector_store %arg3[%c8, %c0_7], %7 {strides = array<i32>} : memref<16x64xf32, #tpu.memory_space<vmem>>, vector<4x64xf32>,
    %c12 = arith.constant 12 : index
    %c0_8 = arith.constant 0 : index
    %9 = vector.load %arg3[%c12, %c0_8] : memref<16x64xf32, #tpu.memory_space<vmem>>, vector<4x64xf32>
    tpu.vector_store %arg3[%c12, %c0_8], %3 {strides = array<i32>} : memref<16x64xf32, #tpu.memory_space<vmem>>, vector<4x64xf32>,
    return
  }
  func.func @transform_0(%arg0: i32) -> (i32, i32) {
    %c0_i32 = arith.constant 0 : i32
    %c0_i32_0 = arith.constant 0 : i32
    return %arg0, %c0_i32 : i32, i32
  }
  func.func @transform_1(%arg0: i32) -> (i32, i32) {
    %c0_i32 = arith.constant 0 : i32
    %c0_i32_0 = arith.constant 0 : i32
    %c0_i32_1 = arith.constant 0 : i32
    return %c0_i32, %c0_i32_0 : i32, i32
  }
  func.func @transform_2(%arg0: i32) -> (i32, i32) {
    %c0_i32 = arith.constant 0 : i32
    %c0_i32_0 = arith.constant 0 : i32
    return %arg0, %c0_i32 : i32, i32
  }
}

</mosaic_0001>

<bundles_post_ra>
// kernel: downsample_b.1
= control target key start
LH: loop header
LB: loop body
LE: loop exit
PB: predicated region body
PF: predicated region fallthrough
CT: control target
= control target key end

     0   :  { %7 = vsyncpa [#allocation3], 0  ;;  %s201_s9 = smov [#allocation2]   ;;  %s241_s0 = inlined_call_operand.vmem [shape: f32[8,256], index: 0, kind: input, shape index: {}]   ;;  %s242_s1 = inlined_call_operand.hbm [shape: f32[256,64], index: 1, kind: input, shape index: {}]   ;;  %s243_s2 = inlined_call_operand.vmem [shape: f32[16,64], index: 2, kind: output, shape index: {}]  }
   0x1   :  { %s15_s10 = sshll.u32 %s201_s9, 4  ;;  %s16_s10 = int_to_ptr.vmem [resolvable:$true] %s15_s10 }
   0x2   :  { %s187_s11 = scalar_lea.vmem %s16_s10, 4096  ;;  %p192_p1 = scmp.lt.s32.totalorder %s16_s10, %s16_s10 }
   0x3   :  { %p188_p0 = scmp.ne.s32.totalorder %s16_s10, %s187_s11  ;;  %p193_p2 = scmp.lt.s32.totalorder %s187_s11, %s187_s11 }
   0x5   :  { %p194_p3 = por %p193_p2, %p192_p1 }
   0x7   :  { %p195_p4 = pnand %p194_p3, %p188_p0 }
   0x9   :  { %198 = shalt.err (!%p195_p4)
}
   0xa   :  { %s202_s12 = smov 128   ;;  %s203_s13 = smov 8  }
   0xb   :  { %21 = dma.hbm_to_vmem [thread:$0]  %s242_s1, 4096, %s16_s10, [#allocation3], %s202_s12, %s202_s12, %s203_s13  }
   0xc   :  { %199 = dma.done.wait [#allocation3], 4096  }
   0xd   :  { %200 = vsyncadd [#allocation3], 4294963200  ;;  %v58_v0 = vld [vmem:[#allocation2 + $0xf8] sm:$0xff]  ;;  %v57_v2 = vld [vmem:[#allocation2 + $0xf0] sm:$0xff]  ;;  %vm129_vm0 = vcmask 519168   ;;  %v204_v34 = vmov 0.0  }
   0xe   :  { %v42_v1 = vld [vmem:[#allocation2 + $0x78] sm:$0xff]  ;;  %140 = vmatprep.subr.mxu0 %v58_v0  ;;  %v41_v3 = vld [vmem:[#allocation2 + $0x70] sm:$0xff]  ;;  %v56_v4 = vld [vmem:[#allocation2 + $0xe8] sm:$0xff]  ;;  %131 = vst.msk [vmem:[%s243_s2 + $0x4] sm:$0xf] %vm129_vm0, %v204_v34  ;;  %vm132_vm1 = vcmask 523268  }
   0xf   :  { %141 = vmatpush3.msra.mxu0 %v42_v1  ;;  %v40_v5 = vld [vmem:[#allocation2 + $0x68] sm:$0xff]  ;;  %v55_v6 = vld [vmem:[#allocation2 + $0xe0] sm:$0xff]  ;;  %v54_v8 = vld [vmem:[#allocation2 + $0xd8] sm:$0xff]  ;;  %134 = vst.msk [vmem:[%s243_s2 + $0xc] sm:$0xf] %vm129_vm0, %v204_v34 }
  0x10   :  { %142 = vmatprep.subr.mxu0 %v57_v2  ;;  %v39_v7 = vld [vmem:[#allocation2 + $0x60] sm:$0xff]  ;;  %v38_v9 = vld [vmem:[#allocation2 + $0x58] sm:$0xff]  ;;  %v53_v10 = vld [vmem:[#allocation2 + $0xd0] sm:$0xff] }
  0x11   :  { %143 = vmatpush3.msra.mxu0 %v41_v3  ;;  %v37_v11 = vld [vmem:[#allocation2 + $0x50] sm:$0xff]  ;;  %v52_v12 = vld [vmem:[#allocation2 + $0xc8] sm:$0xff]  ;;  %v51_v15 = vld [vmem:[#allocation2 + $0xc0] sm:$0xff] }
  0x12   :  { %144 = vmatprep.subr.mxu0 %v56_v4  ;;  %v26_v13 = vld [vmem:[%s241_s0 + $0x8] sm:$0xff]  ;;  %v35_v16 = vld [vmem:[#allocation2 + $0x40] sm:$0xff]  ;;  %v50_v17 = vld [vmem:[#allocation2 + $0xb8] sm:$0xff] }
  0x13   :  { %145 = vmatpush3.msra.mxu0 %v40_v5  ;;  %v36_v14 = vld [vmem:[#allocation2 + $0x48] sm:$0xff]  ;;  %123 = vmatprep.mubr.f32.mxu0 %v26_v13  ;;  %v34_v18 = vld [vmem:[#allocation2 + $0x38] sm:$0xff]  ;;  %v49_v19 = vld [vmem:[#allocation2 + $0xb0] sm:$0xff] }
  0x14   :  { %146 = vmatprep.subr.mxu0 %v55_v6  ;;  %v33_v20 = vld [vmem:[#allocation2 + $0x30] sm:$0xff]  ;;  %v48_v21 = vld [vmem:[#allocation2 + $0xa8] sm:$0xff]  ;;  %v47_v23 = vld [vmem:[#allocation2 + $0xa0] sm:$0xff] }
  0x15   :  { %147 = vmatpush3.msra.mxu0 %v39_v7  ;;  %v32_v22 = vld [vmem:[#allocation2 + $0x28] sm:$0xff]  ;;  %v31_v24 = vld [vmem:[#allocation2 + $0x20] sm:$0xff]  ;;  %v46_v25 = vld [vmem:[#allocation2 + $0x98] sm:$0xff] }
  0x16   :  { %148 = vmatprep.subr.mxu0 %v54_v8  ;;  %v30_v26 = vld [vmem:[#allocation2 + $0x18] sm:$0xff]  ;;  %v45_v27 = vld [vmem:[#allocation2 + $0x90] sm:$0xff]  ;;  %v44_v29 = vld [vmem:[#allocation2 + $0x88] sm:$0xff] }
  0x17   :  { %149 = vmatpush3.msra.mxu0 %v38_v9  ;;  %v29_v28 = vld [vmem:[#allocation2 + $0x10] sm:$0xff]  ;;  %v28_v30 = vld [vmem:[#allocation2 + $0x8] sm:$0xff]  ;;  %v43_v31 = vld [vmem:[#allocation2 + $0x80] sm:$0xff] }
  0x18   :  { %150 = vmatprep.subr.mxu0 %v53_v10  ;;  %v27_v32 = vld [vmem:[#allocation2] sm:$0xff] }
  0x19   :  { %151 = vmatpush3.msra.mxu0 %v37_v11  ;;  %v25_v33 = vld [vmem:[%s241_s0] sm:$0xff] }
  0x1a   :  { %152 = vmatprep.subr.mxu0 %v52_v12 }
  0x1b   :  { %153 = vmatpush3.msra.mxu0 %v36_v14 }
  0x1c   :  { %154 = vmatprep.subr.mxu0 %v51_v15 }
  0x1d   :  { %155 = vmatpush3.msra.mxu0 %v35_v16 }
  0x1e   :  { %156 = vmatprep.subr.mxu0 %v50_v17 }
  0x1f   :  { %157 = vmatpush3.msra.mxu0 %v34_v18 }
  0x20   :  { %158 = vmatprep.subr.mxu0 %v49_v19 }
  0x21   :  { %159 = vmatpush3.msra.mxu0 %v33_v20 }
  0x22   :  { %160 = vmatprep.subr.mxu0 %v48_v21 }
  0x23   :  { %161 = vmatpush3.msra.mxu0 %v32_v22 }
  0x24   :  { %162 = vmatprep.subr.mxu0 %v47_v23 }
  0x25   :  { %163 = vmatpush3.msra.mxu0 %v31_v24 }
  0x26   :  { %164 = vmatprep.subr.mxu0 %v46_v25 }
  0x27   :  { %165 = vmatpush3.msra.mxu0 %v30_v26 }
  0x28   :  { %166 = vmatprep.subr.mxu0 %v45_v27 }
  0x29   :  { %167 = vmatpush3.msra.mxu0 %v29_v28 }
  0x2a   :  { %168 = vmatprep.subr.mxu0 %v44_v29 }
  0x2b   :  { %169 = vmatpush3.msra.mxu0 %v28_v30 }
  0x2c   :  { %170 = vmatprep.subr.mxu0 %v43_v31 }
  0x2d   :  { %171 = vmatpush3.msra.mxu0 %v27_v32 }
  0x2e   :  { %124 = vmatmul.mubr.f32.vlgmr.msra.gmra.mxu0 %v25_v33 }
  0xee   :  { %v172_v35 = vpop.f32.mrf.mxu0 }
  0xf0   :  { %v173_v36 = vpop.f32.mrf.mxu0 }
  0xf1   :  { %v174_v37 = vadd.f32 %v173_v36, %v172_v35 }
  0xf3   :  { %130 = vst.msk [vmem:[%s243_s2] sm:$0xf] %vm129_vm0, %v174_v37 }
  0xf4   :  { %133 = vst.msk [vmem:[%s243_s2 + $0x4] sm:$0xf0] %vm132_vm1, %v174_v37 }
  0xf5   :  { %139 = vsyncpa [#allocation3], 1 }

</bundles_post_ra>
